<compile_context>
chip_gen: v5e
topology: v5e:2x2
jax: 0.10.0
libtpu: 0.0.40
codegen_flags: <defaults>
</compile_context>

<pallas_src>
import functools

import jax
import jax.numpy as jnp
from jax import lax
from jax.experimental import pallas as pl
from jax.experimental.pallas import tpu as pltpu

# ----------------------------- model sizes ---------------------------------
H1, H2, H3 = 16, 32, 32
EMBED = 64          # body_feature = 13 + 9 + 9 + 15 + 15 + 3 = 64
VOCAB = 64          # classifier output is added back onto x (dim 64)
XDIM = 64
HCAT = 2 * H3       # combined [h_upper | h_lower] width = 64

IDX_UPPER = tuple(range(31)) + (61, 62, 63)           # 34 features
IDX_LOWER = tuple(range(13)) + tuple(range(31, 64))   # 46 features

T_CHUNK = 128       # frames decoded per grid step (output chunk resident in VMEM)

HP = jax.lax.Precision.HIGHEST


# ------------------------------ the kernel ---------------------------------
def decoder_kernel(t_total, t_chunk, n_chunks,
                   x0_ref, h0_ref, wg_ref, bg_ref, wc_ref, bc_ref,
                   out_ref, x_s, h_s):
    c = pl.program_id(0)

    @pl.when(c == 0)
    def _():
        x_s[...] = x0_ref[...]
        h_s[...] = h0_ref[...]

    B = x0_ref.shape[0]
    H = HCAT

    # Hoist the bias broadcasts out of the frame loop (not CSE'd otherwise).
    bg = jnp.broadcast_to(bg_ref[...], (B, 4 * H))   # (B, 256)
    bc = jnp.broadcast_to(bc_ref[...], (B, VOCAB))   # (B, 64)

    if n_chunks == 1:
        steps = t_total                                   # static trip count
    else:
        last_steps = t_total - (n_chunks - 1) * t_chunk
        steps = jnp.where(c == n_chunks - 1, last_steps, t_chunk)

    def body(i, carry):
        x, h = carry            # x: (B, 64), h: (B, 64) = [h_up | h_lo]

        # Single fused GRU matmul for both cells.
        # Column layout: [r_up r_lo | z_up z_lo | gi_n_up gi_n_lo | gh_n_up gh_n_lo]
        xh = jnp.concatenate([x, h], axis=1)              # (B, 128)
        g = jnp.dot(xh, wg_ref[...], preferred_element_type=jnp.float32) + bg
        r = jax.nn.sigmoid(g[:, :H])
        z = jax.nn.sigmoid(g[:, H:2 * H])
        n = jnp.tanh(g[:, 2 * H:3 * H] + r * g[:, 3 * H:])
        h_new = (1.0 - z) * n + z * h

        # Entire VelSymDecoderCell (purely affine) as one precomposed matmul.
        yhat = jnp.dot(h_new, wc_ref[...], preferred_element_type=jnp.float32) + bc

        x_new = yhat + x        # tp + x ; teacher-forcing mask is 0 (epoch=inf)
        out_ref[i] = x_new
        return x_new, h_new

    x_fin, h_fin = lax.fori_loop(0, steps, body, (x_s[...], h_s[...]))
    x_s[...] = x_fin
    h_s[...] = h_fin


# --------------------------- parameter handling -----------------------------
def init_params(key):
    """PyTorch-style parameter shapes, deterministically initialized."""
    def uni(key, shape, fan_in):
        bound = 1.0 / (fan_in ** 0.5)
        return jax.random.uniform(key, shape, jnp.float32, -bound, bound)

    keys = iter(jax.random.split(key, 64))
    p = {}
    # GRU cells: weight_ih (3H, in), weight_hh (3H, H), bias_ih (3H), bias_hh (3H)
    p["rnn_upper"] = (uni(next(keys), (3 * H3, 34), H3), uni(next(keys), (3 * H3, H3), H3),
                      uni(next(keys), (3 * H3,), H3), uni(next(keys), (3 * H3,), H3))
    p["rnn_lower"] = (uni(next(keys), (3 * H3, 46), H3), uni(next(keys), (3 * H3, H3), H3),
                      uni(next(keys), (3 * H3,), H3), uni(next(keys), (3 * H3,), H3))
    # Linear layers: (out, in) weight, (out,) bias
    def lin_p(out, inp):
        return (uni(next(keys), (out, inp), inp), uni(next(keys), (out,), inp))
    p["l1_rarm"] = lin_p(9, H1)
    p["l1_larm"] = lin_p(9, H1)
    p["l1_rleg"] = lin_p(15, H1)
    p["l1_lleg"] = lin_p(15, H1)
    p["l1_torso"] = lin_p(16, H1)
    p["l2_rarm"] = lin_p(2 * H1, H2)
    p["l2_larm"] = lin_p(2 * H1, H2)
    p["l2_rleg"] = lin_p(2 * H1, H2)
    p["l2_lleg"] = lin_p(2 * H1, H2)
    p["l3_arm"] = lin_p(2 * H2, H3)
    p["l3_leg"] = lin_p(2 * H2, H3)
    p["classifier"] = lin_p(VOCAB, EMBED)
    return p


def _blkdiag(blocks):
    r = sum(b.shape[0] for b in blocks)
    c = sum(b.shape[1] for b in blocks)
    out = jnp.zeros((r, c), jnp.float32)
    i = j = 0
    for b in blocks:
        out = out.at[i:i + b.shape[0], j:j + b.shape[1]].set(b)
        i += b.shape[0]
        j += b.shape[1]
    return out


def pack_params_fused(p):
    """Fuse all the tiny layers into 4 MXU-shaped arrays (exact up to f32 reassoc)."""
    hdot = functools.partial(jnp.dot, precision=HP)

    wih_u, whh_u, bih_u, bhh_u = p["rnn_upper"]
    wih_l, whh_l, bih_l, bhh_l = p["rnn_lower"]

    # Fold the x -> x_upper / x_lower column selections into the input weights.
    def sel_fuse(w_ih, idx):
        wx = jnp.zeros((XDIM, w_ih.shape[0]), jnp.float32)
        return wx.at[jnp.array(idx)].set(w_ih.T)      # (64, 96), cols r|z|n

    Wxu, Wxl = sel_fuse(wih_u, IDX_UPPER), sel_fuse(wih_l, IDX_LOWER)
    Whu, Whl = whh_u.T, whh_l.T                        # (32, 96) each

    H = H3

    def gcols(w, g):                                   # gate g (0=r, 1=z, 2=n)
        return w[:, g * H:(g + 1) * H]

    def gvec(b, g):
        return b[g * H:(g + 1) * H]

    # Single fused GRU matrix over input [x(64) | h_up(32) | h_lo(32)].
    # Output columns: [r(64) | z(64) | gi_n(64) | gh_n(64)], each gate [up|lo].
    Wg = jnp.zeros((XDIM + HCAT, 4 * HCAT), jnp.float32)    # (128, 256)
    bg = jnp.zeros((4 * HCAT,), jnp.float32)
    for g, off in ((0, 0), (1, HCAT)):                      # r, z: gi+gh summed
        Wg = Wg.at[:XDIM, off:off + H].set(gcols(Wxu, g))
        Wg = Wg.at[:XDIM, off + H:off + 2 * H].set(gcols(Wxl, g))
        Wg = Wg.at[XDIM:XDIM + H, off:off + H].set(gcols(Whu, g))
        Wg = Wg.at[XDIM + H:, off + H:off + 2 * H].set(gcols(Whl, g))
        bg = bg.at[off:off + H].set(gvec(bih_u, g) + gvec(bhh_u, g))
        bg = bg.at[off + H:off + 2 * H].set(gvec(bih_l, g) + gvec(bhh_l, g))
    off_gi, off_gh = 2 * HCAT, 3 * HCAT                     # n gate kept split
    Wg = Wg.at[:XDIM, off_gi:off_gi + H].set(gcols(Wxu, 2))
    Wg = Wg.at[:XDIM, off_gi + H:off_gi + 2 * H].set(gcols(Wxl, 2))
    Wg = Wg.at[XDIM:XDIM + H, off_gh:off_gh + H].set(gcols(Whu, 2))
    Wg = Wg.at[XDIM + H:, off_gh + H:off_gh + 2 * H].set(gcols(Whl, 2))
    bg = bg.at[off_gi:off_gi + H].set(gvec(bih_u, 2))
    bg = bg.at[off_gi + H:off_gi + 2 * H].set(gvec(bih_l, 2))
    bg = bg.at[off_gh:off_gh + H].set(gvec(bhh_u, 2))
    bg = bg.at[off_gh + H:off_gh + 2 * H].set(gvec(bhh_l, 2))

    # ---- VelSymDecoderCell: purely affine -> collapse to one (64, 64) map. ----
    # Layer 3 (arm | leg) block-diagonal over [h_up | h_lo].
    w3a, b3a = p["l3_arm"]
    w3l, b3l = p["l3_leg"]
    w3_f = _blkdiag([w3a.T, w3l.T])                    # (64, 128)
    b3_f = jnp.concatenate([b3a, b3l])[None, :]        # (1, 128)

    # Layer 2 (rarm | larm | rleg | lleg) block-diagonal.
    w2_f = _blkdiag([p["l2_rarm"][0].T, p["l2_larm"][0].T,
                     p["l2_rleg"][0].T, p["l2_lleg"][0].T])           # (128, 128)
    b2_f = jnp.concatenate([p["l2_rarm"][1], p["l2_larm"][1],
                            p["l2_rleg"][1], p["l2_lleg"][1]])[None, :]

    # Layer 1 + classifier precomposed into a single (128, 64) matrix.
    wc, bc = p["classifier"]                           # (V, 64), (V,)
    wc_t = jnp.concatenate([wc[:, 0:13], wc[:, 61:64]], axis=1).T     # (16, V)
    wc_la, wc_ra = wc[:, 13:22].T, wc[:, 22:31].T                     # (9, V)
    wc_ll, wc_rl = wc[:, 31:46].T, wc[:, 46:61].T                     # (15, V)

    w1ra, b1ra = p["l1_rarm"]
    w1la, b1la = p["l1_larm"]
    w1rl, b1rl = p["l1_rleg"]
    w1ll, b1ll = p["l1_lleg"]
    w1t, b1t = p["l1_torso"]

    t_blk = 0.25 * hdot(w1t.T, wc_t)                   # shared torso block (16, V)
    wyc_f = jnp.concatenate([
        hdot(w1ra.T, wc_ra), t_blk,
        hdot(w1la.T, wc_la), t_blk,
        hdot(w1rl.T, wc_rl), t_blk,
        hdot(w1ll.T, wc_ll), t_blk,
    ], axis=0)                                         # (128, V)
    byc_f = (bc + hdot(b1ra, wc_ra) + hdot(b1la, wc_la)
             + hdot(b1rl, wc_rl) + hdot(b1ll, wc_ll)
             + hdot(b1t, wc_t))[None, :]               # (1, V)

    # Compose layer3 -> layer2 -> (layer1+classifier) into one affine map.
    w23 = hdot(w2_f, wyc_f)                            # (128, 64)
    Wc_fused = hdot(w3_f, w23)                         # (64, 64)
    bc_fused = hdot(b3_f, w23) + hdot(b2_f, wyc_f) + byc_f   # (1, 64)

    return [Wg, bg[None, :], Wc_fused, bc_fused]


# ------------------------------- wrapper ------------------------------------
def vel_sym_decoder(params, h_upper, h_lower, time_steps, gt, t_chunk=T_CHUNK):
    B = gt.shape[0]
    x0 = gt[:, 0, :].astype(jnp.float32)
    h0 = jnp.concatenate([h_upper, h_lower], axis=1).astype(jnp.float32)
    packed = pack_params_fused(params)

    tc = min(t_chunk, time_steps)
    n_chunks = -(-time_steps // tc)
    t_pad = n_chunks * tc

    full2d = lambda shape: pl.BlockSpec(shape, lambda c: (0, 0))
    in_specs = ([full2d((B, XDIM)), full2d((B, HCAT))]
                + [full2d(w.shape) for w in packed])

    kernel = functools.partial(decoder_kernel, time_steps, tc, n_chunks)

    out = pl.pallas_call(
        kernel,
        out_shape=jax.ShapeDtypeStruct((t_pad, B, VOCAB), jnp.float32),
        grid_spec=pltpu.PrefetchScalarGridSpec(
            num_scalar_prefetch=0,
            grid=(n_chunks,),
            in_specs=in_specs,
            out_specs=pl.BlockSpec((tc, B, VOCAB), lambda c: (c, 0, 0)),
            scratch_shapes=[
                pltpu.VMEM((B, XDIM), jnp.float32),    # carried x
                pltpu.VMEM((B, HCAT), jnp.float32),    # carried [h_up | h_lo]
            ],
        ),
        compiler_params=pltpu.CompilerParams(
            dimension_semantics=("arbitrary",)),       # recurrence is serial
    )(x0, h0, *packed)

    out = out[:time_steps]                             # drop chunk padding
    return jnp.transpose(out, (1, 0, 2))               # (B, T, V), PyTorch convention


# --------------------------- pure-JAX reference ------------------------------
def reference_forward(p, h_up, h_lo, time_steps, gt):
    def gru_cell(x, h, w_ih, w_hh, b_ih, b_hh):
        gi = x @ w_ih.T + b_ih
        gh = h @ w_hh.T + b_hh
        H = h.shape[-1]
        r = jax.nn.sigmoid(gi[:, :H] + gh[:, :H])
        z = jax.nn.sigmoid(gi[:, H:2 * H] + gh[:, H:2 * H])
        n = jnp.tanh(gi[:, 2 * H:] + r * gh[:, 2 * H:])
        return (1 - z) * n + z * h

    def lin(x, w, b):
        return x @ w.T + b

    x = gt[:, 0, :]
    ys = []
    for _ in range(time_steps):
        x_up = jnp.concatenate([x[:, :31], x[:, 61:64]], axis=-1)
        x_lo = jnp.concatenate([x[:, :13], x[:, 31:64]], axis=-1)
        h_up = gru_cell(x_up, h_up, *p["rnn_upper"])
        h_lo = gru_cell(x_lo, h_lo, *p["rnn_lower"])
        upper = lin(h_up, *p["l3_arm"])
        lower = lin(h_lo, *p["l3_leg"])
        h2 = upper.shape[-1] // 2
        ra2 = lin(upper[:, :h2], *p["l2_rarm"])
        la2 = lin(upper[:, h2:], *p["l2_larm"])
        rl2 = lin(lower[:, :h2], *p["l2_rleg"])
        ll2 = lin(lower[:, h2:], *p["l2_lleg"])
        h1 = ra2.shape[-1] // 2
        ra1 = lin(ra2[:, :h1], *p["l1_rarm"])
        t1 = lin(ra2[:, h1:], *p["l1_torso"])
        la1 = lin(la2[:, :h1], *p["l1_larm"])
        t2 = lin(la2[:, h1:], *p["l1_torso"])
        rl1 = lin(rl2[:, :h1], *p["l1_rleg"])
        t3 = lin(rl2[:, h1:], *p["l1_torso"])
        ll1 = lin(ll2[:, :h1], *p["l1_lleg"])
        t4 = lin(ll2[:, h1:], *p["l1_torso"])
        torso = (t1 + t2 + t3 + t4) / 4.0
        body = jnp.concatenate(
            [torso[:, :13], la1, ra1, ll1, rl1, torso[:, -3:]], axis=-1)
        yhat = lin(body, *p["classifier"])
        x = yhat + x
        ys.append(x[:, None, :])
        # epoch = inf -> TeacherForcing mask = 0 -> x unchanged
    return jnp.concatenate(ys, axis=1)


# --------------------------------- main --------------------------------------
if __name__ == "__main__":
    B, T = 8, 6
    key = jax.random.PRNGKey(0)
    k_p, k_hu, k_hl, k_gt = jax.random.split(key, 4)

    params = init_params(k_p)
    h_upper = 0.1 * jax.random.normal(k_hu, (B, H3), jnp.float32)
    h_lower = 0.1 * jax.random.normal(k_hl, (B, H3), jnp.float32)
    gt = 0.1 * jax.random.normal(k_gt, (B, T, VOCAB), jnp.float32)

    out = vel_sym_decoder(params, h_upper, h_lower, T, gt)
    out = jax.block_until_ready(out)

    ref = reference_forward(params, h_upper, h_lower, T, gt)
    assert out.shape == (B, T, VOCAB)
    max_err = float(jnp.max(jnp.abs(out - ref)))
    assert jnp.allclose(out, ref, rtol=5e-4, atol=5e-4), max_err
    print("KERNEL_OK")
</pallas_src>

<mosaic_0001>
module attributes {stable_mosaic.version = 11 : i64} {
  func.func @decoder_kernel(%arg0: i32, %arg1: memref<8x64xf32, #tpu.memory_space<vmem>>, %arg2: memref<8x64xf32, #tpu.memory_space<vmem>>, %arg3: memref<128x256xf32, #tpu.memory_space<vmem>>, %arg4: memref<1x256xf32, #tpu.memory_space<vmem>>, %arg5: memref<64x64xf32, #tpu.memory_space<vmem>>, %arg6: memref<1x64xf32, #tpu.memory_space<vmem>>, %arg7: memref<6x8x64xf32, #tpu.memory_space<vmem>>, %arg8: memref<8x64xf32, #tpu.memory_space<vmem>>, %arg9: memref<8x64xf32, #tpu.memory_space<vmem>>) attributes {dimension_semantics = [#tpu.dimension_semantics<arbitrary>], iteration_bounds = array<i64: 1>, scalar_prefetch = 0 : i64, scratch_operands = 2 : i64, tpu.core_type = #tpu.core_type<tc>, window_params = [{pipeline_mode = #tpu.pipeline_mode<synchronous>, transform_indices = @transform_0, window_bounds = array<i64: 8, 64>}, {pipeline_mode = #tpu.pipeline_mode<synchronous>, transform_indices = @transform_1, window_bounds = array<i64: 8, 64>}, {pipeline_mode = #tpu.pipeline_mode<synchronous>, transform_indices = @transform_2, window_bounds = array<i64: 128, 256>}, {pipeline_mode = #tpu.pipeline_mode<synchronous>, transform_indices = @transform_3, window_bounds = array<i64: 1, 256>}, {pipeline_mode = #tpu.pipeline_mode<synchronous>, transform_indices = @transform_4, window_bounds = array<i64: 64, 64>}, {pipeline_mode = #tpu.pipeline_mode<synchronous>, transform_indices = @transform_5, window_bounds = array<i64: 1, 64>}, {transform_indices = @transform_6, window_bounds = array<i64: 6, 8, 64>}]} {
    %c0_i32 = arith.constant 0 : i32
    %0 = arith.cmpi eq, %arg0, %c0_i32 : i32
    %1 = arith.extui %0 : i1 to i32
    %c0_i32_0 = arith.constant 0 : i32
    %2 = arith.cmpi ne, %1, %c0_i32_0 : i32
    scf.if %2 {
      %c0_14 = arith.constant 0 : index
      %c0_15 = arith.constant 0 : index
      %15 = vector.load %arg1[%c0_14, %c0_15] : memref<8x64xf32, #tpu.memory_space<vmem>>, vector<8x64xf32>
      %c0_16 = arith.constant 0 : index
      %c0_17 = arith.constant 0 : index
      %16 = vector.load %arg8[%c0_16, %c0_17] : memref<8x64xf32, #tpu.memory_space<vmem>>, vector<8x64xf32>
      tpu.vector_store %arg8[%c0_16, %c0_17], %15 {strides = array<i32>} : memref<8x64xf32, #tpu.memory_space<vmem>>, vector<8x64xf32>,
      %c0_18 = arith.constant 0 : index
      %c0_19 = arith.constant 0 : index
      %17 = vector.load %arg2[%c0_18, %c0_19] : memref<8x64xf32, #tpu.memory_space<vmem>>, vector<8x64xf32>
      %c0_20 = arith.constant 0 : index
      %c0_21 = arith.constant 0 : index
      %18 = vector.load %arg9[%c0_20, %c0_21] : memref<8x64xf32, #tpu.memory_space<vmem>>, vector<8x64xf32>
      tpu.vector_store %arg9[%c0_20, %c0_21], %17 {strides = array<i32>} : memref<8x64xf32, #tpu.memory_space<vmem>>, vector<8x64xf32>,
    } else {
    }
    %c0 = arith.constant 0 : index
    %c0_1 = arith.constant 0 : index
    %3 = vector.load %arg4[%c0, %c0_1] : memref<1x256xf32, #tpu.memory_space<vmem>>, vector<1x256xf32>
    %4 = vector.shape_cast %3 : vector<1x256xf32> to vector<1x256xf32>
    %5 = vector.broadcast %4 : vector<1x256xf32> to vector<8x256xf32>
    %c0_2 = arith.constant 0 : index
    %c0_3 = arith.constant 0 : index
    %6 = vector.load %arg6[%c0_2, %c0_3] : memref<1x64xf32, #tpu.memory_space<vmem>>, vector<1x64xf32>
    %7 = vector.shape_cast %6 : vector<1x64xf32> to vector<1x64xf32>
    %8 = vector.broadcast %7 : vector<1x64xf32> to vector<8x64xf32>
    %c0_4 = arith.constant 0 : index
    %c0_5 = arith.constant 0 : index
    %9 = vector.load %arg8[%c0_4, %c0_5] : memref<8x64xf32, #tpu.memory_space<vmem>>, vector<8x64xf32>
    %c0_6 = arith.constant 0 : index
    %c0_7 = arith.constant 0 : index
    %10 = vector.load %arg9[%c0_6, %c0_7] : memref<8x64xf32, #tpu.memory_space<vmem>>, vector<8x64xf32>
    %c0_i32_8 = arith.constant 0 : i32
    %c6_i32 = arith.constant 6 : i32
    %11 = arith.addi %c0_i32_8, %c6_i32 : i32
    %c1_i32 = arith.constant 1 : i32
    %12:2 = scf.for %arg10 = %c0_i32_8 to %11 step %c1_i32 iter_args(%arg11 = %9, %arg12 = %10) -> (vector<8x64xf32>, vector<8x64xf32>)  : i32 {
      %15 = tpu.concatenate %arg11, %arg12 in 1 : vector<8x64xf32>, vector<8x64xf32> -> vector<8x128xf32>
      %c0_14 = arith.constant 0 : index
      %c0_15 = arith.constant 0 : index
      %16 = vector.load %arg3[%c0_14, %c0_15] : memref<128x256xf32, #tpu.memory_space<vmem>>, vector<128x256xf32>
      %cst = arith.constant dense<0.000000e+00> : vector<8x256xf32>
      %17 = tpu.matmul %15, %16, %cst {dimension_numbers = #tpu.dot_dimension_numbers<[1], [0], [0], [1], [0, 0, 1, 1], [], []>} : vector<8x128xf32>, vector<128x256xf32>, vector<8x256xf32> -> vector<8x256xf32>
      %18 = arith.addf %17, %5 : vector<8x256xf32>
      %19 = vector.extract_strided_slice %18 {offsets = [0, 0], sizes = [8, 64], strides = [1, 1]} : vector<8x256xf32> to vector<8x64xf32>
      %20 = arith.negf %19 : vector<8x64xf32>
      %21 = math.exp %20 : vector<8x64xf32>
      %cst_16 = arith.constant 1.000000e+00 : f32
      %22 = vector.broadcast %cst_16 : f32 to vector<8x64xf32>
      %23 = arith.addf %22, %21 : vector<8x64xf32>
      %24 = arith.divf %22, %23 : vector<8x64xf32>
      %25 = vector.extract_strided_slice %18 {offsets = [0, 64], sizes = [8, 64], strides = [1, 1]} : vector<8x256xf32> to vector<8x64xf32>
      %26 = arith.negf %25 : vector<8x64xf32>
      %27 = math.exp %26 : vector<8x64xf32>
      %cst_17 = arith.constant 1.000000e+00 : f32
      %28 = vector.broadcast %cst_17 : f32 to vector<8x64xf32>
      %29 = arith.addf %28, %27 : vector<8x64xf32>
      %30 = arith.divf %28, %29 : vector<8x64xf32>
      %31 = vector.extract_strided_slice %18 {offsets = [0, 128], sizes = [8, 64], strides = [1, 1]} : vector<8x256xf32> to vector<8x64xf32>
      %32 = vector.extract_strided_slice %18 {offsets = [0, 192], sizes = [8, 64], strides = [1, 1]} : vector<8x256xf32> to vector<8x64xf32>
      %33 = arith.mulf %24, %32 : vector<8x64xf32>
      %34 = arith.addf %31, %33 : vector<8x64xf32>
      %35 = math.tanh %34 : vector<8x64xf32>
      %cst_18 = arith.constant 1.000000e+00 : f32
      %36 = vector.broadcast %cst_18 : f32 to vector<8x64xf32>
      %37 = arith.subf %36, %30 : vector<8x64xf32>
      %38 = arith.mulf %37, %35 : vector<8x64xf32>
      %39 = arith.mulf %30, %arg12 : vector<8x64xf32>
      %40 = arith.addf %38, %39 : vector<8x64xf32>
      %c0_19 = arith.constant 0 : index
      %c0_20 = arith.constant 0 : index
      %41 = vector.load %arg5[%c0_19, %c0_20] : memref<64x64xf32, #tpu.memory_space<vmem>>, vector<64x64xf32>
      %cst_21 = arith.constant dense<0.000000e+00> : vector<8x64xf32>
      %42 = tpu.matmul %40, %41, %cst_21 {dimension_numbers = #tpu.dot_dimension_numbers<[1], [0], [0], [1], [0, 0, 1, 1], [], []>} : vector<8x64xf32>, vector<64x64xf32>, vector<8x64xf32> -> vector<8x64xf32>
      %43 = arith.addf %42, %8 : vector<8x64xf32>
      %44 = arith.addf %43, %arg11 : vector<8x64xf32>
      %45 = arith.index_cast %arg10 : i32 to index
      %c0_22 = arith.constant 0 : index
      %c0_23 = arith.constant 0 : index
      %46 = vector.load %arg7[%45, %c0_22, %c0_23] : memref<6x8x64xf32, #tpu.memory_space<vmem>>, vector<1x8x64xf32>
      %47 = vector.shape_cast %46 : vector<1x8x64xf32> to vector<8x64xf32>
      %48 = vector.shape_cast %44 : vector<8x64xf32> to vector<1x8x64xf32>
      tpu.vector_store %arg7[%45, %c0_22, %c0_23], %48 {strides = array<i32>} : memref<6x8x64xf32, #tpu.memory_space<vmem>>, vector<1x8x64xf32>,
      scf.yield %44, %40 : vector<8x64xf32>, vector<8x64xf32>
    }
    %c6_i32_9 = arith.constant 6 : i32
    %c0_10 = arith.constant 0 : index
    %c0_11 = arith.constant 0 : index
    %13 = vector.load %arg8[%c0_10, %c0_11] : memref<8x64xf32, #tpu.memory_space<vmem>>, vector<8x64xf32>
    tpu.vector_store %arg8[%c0_10, %c0_11], %12#0 {strides = array<i32>} : memref<8x64xf32, #tpu.memory_space<vmem>>, vector<8x64xf32>,
    %c0_12 = arith.constant 0 : index
    %c0_13 = arith.constant 0 : index
    %14 = vector.load %arg9[%c0_12, %c0_13] : memref<8x64xf32, #tpu.memory_space<vmem>>, vector<8x64xf32>
    tpu.vector_store %arg9[%c0_12, %c0_13], %12#1 {strides = array<i32>} : memref<8x64xf32, #tpu.memory_space<vmem>>, vector<8x64xf32>,
    return
  }
  func.func @transform_0(%arg0: i32) -> (i32, i32) {
    %c0_i32 = arith.constant 0 : i32
    %c0_i32_0 = arith.constant 0 : i32
    %c0_i32_1 = arith.constant 0 : i32
    return %c0_i32, %c0_i32_0 : i32, i32
  }
  func.func @transform_1(%arg0: i32) -> (i32, i32) {
    %c0_i32 = arith.constant 0 : i32
    %c0_i32_0 = arith.constant 0 : i32
    %c0_i32_1 = arith.constant 0 : i32
    return %c0_i32, %c0_i32_0 : i32, i32
  }
  func.func @transform_2(%arg0: i32) -> (i32, i32) {
    %c0_i32 = arith.constant 0 : i32
    %c0_i32_0 = arith.constant 0 : i32
    %c0_i32_1 = arith.constant 0 : i32
    return %c0_i32, %c0_i32_0 : i32, i32
  }
  func.func @transform_3(%arg0: i32) -> (i32, i32) {
    %c0_i32 = arith.constant 0 : i32
    %c0_i32_0 = arith.constant 0 : i32
    %c0_i32_1 = arith.constant 0 : i32
    return %c0_i32, %c0_i32_0 : i32, i32
  }
  func.func @transform_4(%arg0: i32) -> (i32, i32) {
    %c0_i32 = arith.constant 0 : i32
    %c0_i32_0 = arith.constant 0 : i32
    %c0_i32_1 = arith.constant 0 : i32
    return %c0_i32, %c0_i32_0 : i32, i32
  }
  func.func @transform_5(%arg0: i32) -> (i32, i32) {
    %c0_i32 = arith.constant 0 : i32
    %c0_i32_0 = arith.constant 0 : i32
    %c0_i32_1 = arith.constant 0 : i32
    return %c0_i32, %c0_i32_0 : i32, i32
  }
  func.func @transform_6(%arg0: i32) -> (i32, i32, i32) {
    %c0_i32 = arith.constant 0 : i32
    %c0_i32_0 = arith.constant 0 : i32
    %c0_i32_1 = arith.constant 0 : i32
    return %arg0, %c0_i32, %c0_i32_0 : i32, i32, i32
  }
}

</mosaic_0001>

<bundles_post_ra>
// kernel: tpu_custom_call.1
= control target key start
LH: loop header
LB: loop body
LE: loop exit
PB: predicated region body
PF: predicated region fallthrough
CT: control target
= control target key end

     0   :  { %11 = vsyncpa [#allocation5], 0  ;;  %s612_s0 = inlined_call_operand.hbm [shape: f32[8,64], index: 0, kind: input, shape index: {}]   ;;  %s613_s1 = inlined_call_operand.hbm [shape: f32[8,64], index: 1, kind: input, shape index: {}]   ;;  %s614_s2 = inlined_call_operand.hbm [shape: f32[128,256], index: 2, kind: input, shape index: {}]   ;;  %s615_s3 = inlined_call_operand.vmem [shape: f32[1,256], index: 3, kind: input, shape index: {}]   ;;  %s616_s4 = inlined_call_operand.hbm [shape: f32[64,64], index: 4, kind: input, shape index: {}]   ;;  %s617_s5 = inlined_call_operand.vmem [shape: f32[1,64], index: 5, kind: input, shape index: {}]   ;;  %s618_s6 = inlined_call_operand.hbm [shape: f32[6,8,64], index: 6, kind: output, shape index: {}]  }
   0x1   :  { %12 = vsyncpa [#allocation8], 0 }
   0x2   :  { %13 = vsyncpa [#allocation11], 0  ;;  %s31_s23 = sshll.u32 %s613_s1, 4  ;;  %s32_s23 = int_to_ptr.hbm [resolvable:$true] %s31_s23 }
   0x3   :  { %14 = vsyncpa [#allocation6], 0  ;;  %s495_s24 = smov [#allocation7]   ;;  %s20_s28 = sshll.u32 %s612_s0, 4  ;;  %s21_s28 = int_to_ptr.hbm [resolvable:$true] %s20_s28 }
   0x4   :  { %s33_s25 = sshll.u32 %s495_s24, 4  ;;  %s496_s29 = smov [#allocation4]   ;;  %s34_s25 = int_to_ptr.vmem [resolvable:$true] %s33_s25 }
   0x5   :  { %36 = dma.hbm_to_vmem [thread:$0]  %s32_s23, 128, %s34_s25, [#allocation8]  }
   0x6   :  { %s22_s30 = sshll.u32 %s496_s29, 4  ;;  %s41_s9 = sshll.u32 %s614_s2, 4  ;;  %s23_s30 = int_to_ptr.vmem [resolvable:$true] %s22_s30  ;;  %s42_s9 = int_to_ptr.hbm [resolvable:$true] %s41_s9 }
   0x7   :  { %25 = dma.hbm_to_vmem [thread:$0]  %s21_s28, 128, %s23_s30, [#allocation5]  }
   0x8   :  { %s497_s1 = smov [#allocation9]   ;;  %s56_s13 = sshll.u32 %s616_s4, 4  ;;  %s57_s13 = int_to_ptr.hbm [resolvable:$true] %s56_s13 }
   0x9   :  { %s43_s10 = sshll.u32 %s497_s1, 4  ;;  %s498_s14 = smov 256   ;;  %s44_s10 = int_to_ptr.vmem [resolvable:$true] %s43_s10 }
   0xa   :  { %s499_s0 = smov 16   ;;  %s500_s15 = smov [#allocation10]  }
   0xb   :  { %49 = dma.hbm_to_vmem [thread:$0]  %s42_s9, 4096, %s44_s10, [#allocation8], %s498_s14, %s498_s14, %s499_s0  }
   0xc   :  { %s58_s16 = sshll.u32 %s500_s15, 4  ;;  %s501_s17 = smov 128   ;;  %s59_s16 = int_to_ptr.vmem [resolvable:$true] %s58_s16 }
   0xd   :  { %s502_s18 = smov 8  }
   0xe   :  { %64 = dma.hbm_to_vmem [thread:$0]  %s57_s13, 1024, %s59_s16, [#allocation11], %s501_s17, %s501_s17, %s502_s18  }
   0xf   :  { %475 = dma.done.wait [#allocation5], 128  }
  0x10   :  { %476 = vsyncadd [#allocation5], 4294967168 }
  0x11   :  { %477 = dma.done.wait [#allocation8], 4224  }
  0x12   :  { %478 = vsyncadd [#allocation8], 4294963072 }
  0x13   :  { %479 = dma.done.wait [#allocation11], 1024  }
  0x14   :  { %480 = vsyncadd [#allocation11], 4294966272  ;;  %vm88_vm0 = vcmask 523264   ;;  %v558_v0 = vld [vmem:[%s615_s3] sm:$0x3]  ;;  %v87_v4 = vld [vmem:[#allocation4] sm:$0xff] }
  0x15   :  { %v563_v1 = vld [vmem:[%s617_s5] ss:$0 sm:$0xff]  ;;  %v94_v2 = vperm.slane %v558_v0, 0  ;;  %v95_v3 = vperm.slane %v558_v0, 1  ;;  %v90_v5 = vld [vmem:[#allocation7] sm:$0xff]  ;;  %89 = vst.msk [vmem:[#allocation2] sm:$0xff] %vm88_vm0, %v87_v4 }
  0x16   :  { %91 = vst.msk [vmem:[#allocation3] sm:$0xff] %vm88_vm0, %v90_v5  ;;  %s573_s3 = smov 0  }
  0x1c   :  { %v102_v6 = vld [vmem:[#allocation2] sm:$0xff]  }
  0x1d   :  { %v103_v7 = vld [vmem:[#allocation3] sm:$0xff]  }
  0x1e LB: > { %v148_v8 = vld [vmem:[#allocation9 + $0xf0] sm:$0xff]  ;;  %v149_v9 = vld [vmem:[#allocation9 + $0xf8] sm:$0xff]  ;;  %v146_v10 = vld [vmem:[#allocation9 + $0xe0] sm:$0xff]  ;;  %s503_s5 = smov 64   ;;  %s301_s21 = sshll.u32 %s493_s3, 3  ;;  %s493_s3 = sphi %s573_s3, %s109_s3   ;;  %v489_v6 = vphi %v102_v6, %v620_v6   ;;  %v485_v7 = vphi %v103_v7, %v619_v7  }
  0x1f   : > { %150 = vmatpush.msra.mxu0 %v148_v8  ;;  %170 = vmatpush.msra.mxu1 %v149_v9  ;;  %v147_v11 = vld [vmem:[#allocation9 + $0xe8] sm:$0xff]  ;;  %v144_v12 = vld [vmem:[#allocation9 + $0xd0] sm:$0xff]  ;;  %v145_v13 = vld [vmem:[#allocation9 + $0xd8] sm:$0xff]  ;;  %s259_s22 = scalar_lea.vmem [#allocation12], %s301_s21  ;;  %s109_s3 = sadd.s32 1, %s493_s3  }
  0x20   : > { %113 = vrot.lane.b32.xlu0 %v485_v7, %s503_s5  ;;  %v142_v14 = vld [vmem:[#allocation9 + $0xc0] sm:$0xff]  ;;  %v143_v15 = vld [vmem:[#allocation9 + $0xc8] sm:$0xff]  ;;  %v140_v16 = vld [vmem:[#allocation9 + $0xb0] sm:$0xff]  ;;  %p106_p0 = scmp.ge.s32.totalorder %s109_s3, 6  }
  0x21   : > { %151 = vmatpush.msra.mxu0 %v146_v10  ;;  %171 = vmatpush.msra.mxu1 %v147_v11  ;;  %v141_v17 = vld [vmem:[#allocation9 + $0xb8] sm:$0xff]  ;;  %v138_v18 = vld [vmem:[#allocation9 + $0xa0] sm:$0xff]  ;;  %v139_v19 = vld [vmem:[#allocation9 + $0xa8] sm:$0xff]  ;;  %s271_s25 = sshll.u32 (%p106_p0), %s618_s6, 4  ;;  %s504_s26 = smov (%p106_p0), [#allocation12]   ;;  %s272_s25 = int_to_ptr.hbm [resolvable:$true] %s271_s25 }
  0x22   : > { %v136_v20 = vld [vmem:[#allocation9 + $0x90] sm:$0xff]  ;;  %v137_v21 = vld [vmem:[#allocation9 + $0x98] sm:$0xff]  ;;  %v134_v22 = vld [vmem:[#allocation9 + $0x80] sm:$0xff]  ;;  %s269_s27 = sshll.u32 (%p106_p0), %s504_s26, 4  ;;  %s270_s27 = int_to_ptr.vmem [resolvable:$true] %s269_s27 }
  0x23   : > { %152 = vmatpush.msra.mxu0 %v144_v12  ;;  %172 = vmatpush.msra.mxu1 %v145_v13  ;;  %v135_v23 = vld [vmem:[#allocation9 + $0x88] sm:$0xff]  ;;  %v132_v24 = vld [vmem:[#allocation9 + $0x70] sm:$0xff]  ;;  %v133_v25 = vld [vmem:[#allocation9 + $0x78] sm:$0xff] }
  0x24   : > { %v130_v26 = vld [vmem:[#allocation9 + $0x60] sm:$0xff]  ;;  %v131_v27 = vld [vmem:[#allocation9 + $0x68] sm:$0xff]  ;;  %v128_v28 = vld [vmem:[#allocation9 + $0x50] sm:$0xff] }
  0x25   : > { %153 = vmatpush.msra.mxu0 %v142_v14  ;;  %173 = vmatpush.msra.mxu1 %v143_v15  ;;  %v129_v29 = vld [vmem:[#allocation9 + $0x58] sm:$0xff]  ;;  %v126_v30 = vld [vmem:[#allocation9 + $0x40] sm:$0xff]  ;;  %v127_v31 = vld [vmem:[#allocation9 + $0x48] sm:$0xff] }
  0x26   : > { %v124_v32 = vld [vmem:[#allocation9 + $0x30] sm:$0xff]  ;;  %v125_v33 = vld [vmem:[#allocation9 + $0x38] sm:$0xff]  ;;  %v122_v34 = vld [vmem:[#allocation9 + $0x20] sm:$0xff] }
  0x27   : > { %154 = vmatpush.msra.mxu0 %v140_v16  ;;  %174 = vmatpush.msra.mxu1 %v141_v17  ;;  %v123_v35 = vld [vmem:[#allocation9 + $0x28] sm:$0xff]  ;;  %v120_v36 = vld [vmem:[#allocation9 + $0x10] sm:$0xff]  ;;  %v121_v37 = vld [vmem:[#allocation9 + $0x18] sm:$0xff] }
  0x28   : > { %v118_v38 = vld [vmem:[#allocation9] sm:$0xff]  ;;  %v119_v39 = vld [vmem:[#allocation9 + $0x8] sm:$0xff]  ;;  %v231_v63 = vld [vmem:[#allocation10 + $0x38] sm:$0xff] }
  0x29   : > { %155 = vmatpush.msra.mxu0 %v138_v18  ;;  %175 = vmatpush.msra.mxu1 %v139_v19  ;;  %v230_v4 = vld [vmem:[#allocation10 + $0x30] sm:$0xff]  ;;  %v229_v5 = vld [vmem:[#allocation10 + $0x28] sm:$0xff]  ;;  %v228_v7 = vld [vmem:[#allocation10 + $0x20] sm:$0xff] }
  0x2a   : > { %245 = vmatpush.msra.mxu2 %v231_v63  ;;  %v227_v8 = vld [vmem:[#allocation10 + $0x18] sm:$0xff]  ;;  %v226_v9 = vld [vmem:[#allocation10 + $0x10] sm:$0xff]  ;;  %v225_v10 = vld [vmem:[#allocation10 + $0x8] sm:$0xff] }
  0x2b   : > { %156 = vmatpush.msra.mxu0 %v136_v20  ;;  %176 = vmatpush.msra.mxu1 %v137_v21  ;;  %v224_v11 = vld [vmem:[#allocation10] sm:$0xff] }
  0x2c   : > { %246 = vmatpush.msra.mxu2 %v230_v4 }
  0x2d   : > { %157 = vmatpush.msra.mxu0 %v134_v22  ;;  %177 = vmatpush.msra.mxu1 %v135_v23 }
  0x2e   : > { %247 = vmatpush.msra.mxu2 %v229_v5 }
  0x2f   : > { %158 = vmatpush.msra.mxu0 %v132_v24  ;;  %178 = vmatpush.msra.mxu1 %v133_v25 }
  0x30   : > { %248 = vmatpush.msra.mxu2 %v228_v7 }
  0x31   : > { %159 = vmatpush.msra.mxu0 %v130_v26  ;;  %179 = vmatpush.msra.mxu1 %v131_v27 }
  0x32   : > { %249 = vmatpush.msra.mxu2 %v227_v8 }
  0x33   : > { %160 = vmatpush.msra.mxu0 %v128_v28  ;;  %180 = vmatpush.msra.mxu1 %v129_v29 }
  0x34   : > { %250 = vmatpush.msra.mxu2 %v226_v9 }
  0x35   : > { %161 = vmatpush.msra.mxu0 %v126_v30  ;;  %181 = vmatpush.msra.mxu1 %v127_v31 }
  0x36   : > { %251 = vmatpush.msra.mxu2 %v225_v10 }
  0x37   : > { %162 = vmatpush.msra.mxu0 %v124_v32  ;;  %182 = vmatpush.msra.mxu1 %v125_v33 }
  0x38   : > { %252 = vmatpush.msra.mxu2 %v224_v11 }
  0x39   : > { %163 = vmatpush.msra.mxu0 %v122_v34  ;;  %183 = vmatpush.msra.mxu1 %v123_v35 }
  0x3b   : > { %164 = vmatpush.msra.mxu0 %v120_v36  ;;  %184 = vmatpush.msra.mxu1 %v121_v37 }
  0x3d   : > { %165 = vmatpush.msra.mxu0 %v118_v38  ;;  %185 = vmatpush.msra.mxu1 %v119_v39 }
  0x92   : > { %v114_v40 = vpop.permute.xlu0 %113 }
  0x93   : > { %v117_v41 = vsel %vm88_vm0, %v489_v6, %v114_v40 }
  0x94   : > { %166 = vmatmul.f32.vlgmr.msra.gmra.mxu0 %v117_v41  ;;  %186 = vmatmul.f32.vlgmr.msra.gmra.mxu1 %v117_v41 }
 0x111   : > { %v187_v42 = vpop.f32.mrf.mxu1  ;;  %v167_v44 = vpop.f32.mrf.mxu0 }
 0x112   : > { %v188_v43 = vadd.f32 %v187_v42, %v95_v3  ;;  %v168_v45 = vadd.f32 %v167_v44, %v94_v2 }
 0x114   : > { %210 = vrot.lane.b32.xlu0 %v188_v43, %s503_s5  ;;  %v299_v46 = vmul.f32 -1.442695, %v168_v45 }
 0x116   : > { %337 = vpow2.f32 %v299_v46 }
 0x11c   : > { %v338_v47 = vpop.eup %337 }
 0x11d   : > { %v193_v48 = vadd.f32 1.0, %v338_v47 }
 0x11f   : > { %339 = vrcp.f32 %v193_v48  ;;  %v205_v54 = vand.u32 2147483648, %v193_v48  ;;  %vm199_vm2 = vweird.f32 %v193_v48  ;;  %v203_v55 = vand.u32 2147483647, %v193_v48 }
 0x121   : > { %v206_v57 = vor.u32 1.1754944e-38, %v205_v54  ;;  %vm204_vm4 = vcmp.eq.f32.partialorder %v203_v55, 8.507059e+37 }
 0x125   : > { %v340_v49 = vpop.eup %339 }
 0x126   : > { %v195_v50 = vmul.f32 %v340_v49, %v193_v48  ;;  %vm200_vm1 = vweird.f32 %v340_v49 }
 0x127   : > { %vm201_vm3 = vmor %vm199_vm2, %vm200_vm1 }
 0x128   : > { %v196_v51 = vsub.f32 1.0, %v195_v50 }
 0x12a   : > { %v197_v52 = vmul.f32 %v340_v49, %v196_v51 }
 0x12c   : > { %v198_v53 = vadd.f32 %v340_v49, %v197_v52 }
 0x12e   : > { %v202_v56 = vsel %vm201_vm3, %v340_v49, %v198_v53 }
 0x12f   : > { %v207_v59 = vsel %vm204_vm4, %v206_v57, %v202_v56 }
 0x130   : > { %v216_v12 = vsub.f32 1.0, %v207_v59  ;;  %v222_v14 = vmul.f32 %v207_v59, %v114_v40 }
 0x186   : > { %v211_v58 = vpop.permute.xlu0 %210 }
 0x187   : > { %v213_v60 = vmul.f32 %v211_v58, %v207_v59 }
 0x189   : > { %v214_v61 = vadd.f32 %v213_v60, %v188_v43 }
 0x18b   : > { %341 = vtanh.f32 %v214_v61 }
 0x191   : > { %v342_v62 = vpop.eup %341 }
 0x192   : > { %218 = vrot.lane.b32.xlu1 %v342_v62, %s503_s5 }
 0x204   : > { %v219_v13 = vpop.permute.xlu1 %218 }
 0x205   : > { %v221_v15 = vmul.f32 %v219_v13, %v216_v12 }
 0x207   : > { %v223_v16 = vadd.f32 %v222_v14, %v221_v15 }
 0x209   : > { %233 = vrot.lane.b32.xlu1 %v223_v16, %s503_s5 }
 0x27b   : > { %v234_v17 = vpop.permute.xlu1 %233  }
 0x27c   : > { %300 = vmatmul.msk.f32.vlgmr.msra.gmra.mxu2 %vm88_vm0, %v234_v17  ;;  %v619_v7 = vmov %v234_v17  ;;  %264 = vst.msk [vmem:[#allocation3] sm:$0xff] (%p106_p0), %vm88_vm0, %v234_v17 }
 0x2ff   : > { %v254_v18 = vpop.f32.mrf.mxu2 }
 0x300   : > { %v255_v19 = vadd.f32 %v563_v1, %v254_v18  ;;  %108 = sbr.rel (!%p106_p0) target bundleno = 30 (0x1e), region = 72 }
 0x302   : > { %v257_v20 = vadd.f32 %v489_v6, %v255_v19  }
 0x304   : > { %260 = vst.msk [vmem:[%s259_s22] sm:$0xff] %vm88_vm0, %v257_v20  ;;  %v620_v6 = vmov %v257_v20 }
 0x305   :  { %263 = vst.msk [vmem:[#allocation2] sm:$0xff] %vm88_vm0, %v257_v20  ;;  %277 = dma.vmem_to_hbm [thread:$0]  %s270_s27, 768, %s272_s25, [#allocation6], %s501_s17, %s501_s17, %s502_s18  }
 0x306   :  { %481 = dma.done.wait [#allocation6], 768  }
 0x307   :  { %482 = vsyncadd [#allocation6], 4294966528 }
 0x308   :  { %282 = vsyncpa [#allocation5], 1 }
 0x309   :  { %283 = vsyncpa [#allocation8], 1 }
 0x30a   :  { %284 = vsyncpa [#allocation11], 1 }
 0x30b   :  { %285 = vsyncpa [#allocation6], 1 }

</bundles_post_ra>
